<compile_context>
chip_gen: v6e
topology: v6e:2x2x1
jax: 0.10.0
libtpu: 0.0.40
codegen_flags: <defaults>
</compile_context>

<pallas_src>
import jax
import jax.numpy as jnp
from jax.experimental import pallas as pl
from jax.experimental.pallas import tpu as pltpu


def _round_up(x: int, m: int) -> int:
    return ((x + m - 1) // m) * m


def _cdiv(a: int, b: int) -> int:
    return -(-a // b)


# 256 fills the v6e/v7x 256-wide MXU columns; on v5e the extra (zero) columns
# only cost one more cheap MXU pass for small layers.
_FEATURE_ALIGN = 256
_K_ALIGN = 128       # contraction-dim (lane) alignment for bf16 operands
_SUBLANE_ALIGN = 16  # bf16 native sublane tile


def _vmem_budget_bytes() -> int:
    """~70% of this generation's VMEM (≈90 MiB v5e/v6e, ≈45 MiB v7x)."""
    try:
        cap = int(pltpu.get_tpu_info().vmem_capacity_bytes)
    except Exception:  # pragma: no cover - conservative fallback
        cap = 64 * 1024 * 1024
    return int(cap * 0.70)


# --------------------------------------------------------------------------- #
# Kernel
# --------------------------------------------------------------------------- #
def bp_mlp_kernel(x_ref, w1_ref, b1_ref, w2_ref, b2_ref, o_ref):
    # fc1: (TB, Ip)bf16 @ (Ip, Hp)bf16 -> f32 accumulate; bias + ReLU in f32.
    h = jnp.dot(x_ref[...], w1_ref[...], preferred_element_type=jnp.float32)
    h = jnp.maximum(h + b1_ref[...], 0.0)
    # fc2: hidden recast to bf16 for the MXU (intentional mixed precision),
    # accumulate in f32, bias in f32, store in the output dtype.
    out = jnp.dot(h.astype(w2_ref.dtype), w2_ref[...],
                  preferred_element_type=jnp.float32)
    o_ref[...] = (out + b2_ref[...]).astype(o_ref.dtype)
    # TODO(synk): for Hp >= ~2048 chunk the hidden dim inside the kernel
    # (fc1 chunk -> bias/ReLU -> bf16 -> partial fc2 accumulate) to bound the
    # (TB, Hp) f32 intermediate.


# --------------------------------------------------------------------------- #
# One-time parameter preparation (cast + pad).  Do this once, reuse per call.
# --------------------------------------------------------------------------- #
def prepare_params(w1, b1, w2, b2, *, compute_dtype=jnp.bfloat16):
    """Pads/casts weights once.  Weights are (in_features, out_features), the
    transpose of PyTorch nn.Linear's storage, so the kernel computes x @ W + b.
    """
    I, H = w1.shape
    O = w2.shape[1]
    Ip = _round_up(I, _K_ALIGN)
    Hp = _round_up(H, _FEATURE_ALIGN)
    Op = _round_up(O, _FEATURE_ALIGN)

    w1p = jnp.zeros((Ip, Hp), compute_dtype).at[:I, :H].set(w1.astype(compute_dtype))
    b1p = jnp.zeros((1, Hp), jnp.float32).at[:, :H].set(b1.astype(jnp.float32))
    w2p = jnp.zeros((Hp, Op), compute_dtype).at[:H, :O].set(w2.astype(compute_dtype))
    b2p = jnp.zeros((Hp if False else 1, Op), jnp.float32).at[:, :O].set(
        b2.astype(jnp.float32))
    return {"w1": w1p, "b1": b1p, "w2": w2p, "b2": b2p, "dims": (I, H, O)}


# --------------------------------------------------------------------------- #
# Forward
# --------------------------------------------------------------------------- #
def bp_network_forward(x, params, *, block_b: int = 256, out_dtype=None):
    """Fused MLP forward: relu(x @ w1 + b1) @ w2 + b2, with prepared params."""
    w1p, b1p, w2p, b2p = params["w1"], params["b1"], params["w2"], params["b2"]
    I, H, O = params["dims"]
    Ip, Hp = w1p.shape
    Op = w2p.shape[1]
    B = x.shape[0]
    assert x.shape[1] == I
    out_dtype = x.dtype if out_dtype is None else out_dtype
    cdt = w1p.dtype
    cbytes = jnp.dtype(cdt).itemsize
    obytes = jnp.dtype(out_dtype).itemsize

    # ---- batch tile selection: >=2 tiles when possible, 16-aligned, minimal
    # padding waste, capped at block_b, shrunk to fit the VMEM budget. -------
    n_tiles = max(2, _cdiv(B, block_b))
    TB = _round_up(_cdiv(B, n_tiles), _SUBLANE_ALIGN)
    TB = min(TB, _round_up(block_b, _SUBLANE_ALIGN))
    TB = max(TB, _SUBLANE_ALIGN)

    budget = _vmem_budget_bytes()
    weight_bytes = (w1p.size + w2p.size) * cbytes + (b1p.size + b2p.size) * 4

    def _tile_bytes(tb):
        x_buf = 2 * tb * Ip * cbytes            # double-buffered activations
        o_buf = 2 * tb * Op * obytes            # double-buffered outputs
        hidden = tb * Hp * (4 + cbytes)         # f32 h + bf16 recast
        return x_buf + o_buf + hidden

    while TB > _SUBLANE_ALIGN and weight_bytes + _tile_bytes(TB) > budget:
        TB = max(_SUBLANE_ALIGN, _round_up(TB // 2, _SUBLANE_ALIGN))
    # TODO(synk): if weight_bytes alone exceeds the budget (very large I or H),
    # add a K (input-feature) grid axis with an f32 VMEM accumulator so W1
    # streams instead of residing in VMEM.

    Bp = _round_up(B, TB)
    nb = Bp // TB

    # ---- activation pad/cast (skipped when already the right shape) ---------
    if B == Bp and I == Ip and x.dtype == cdt:
        xp = x
    elif B == Bp and I == Ip:
        xp = x.astype(cdt)
    else:
        xp = jnp.zeros((Bp, Ip), cdt).at[:B, :I].set(x.astype(cdt))

    flops = 2 * Bp * (Ip * Hp + Hp * Op)
    bytes_accessed = (
        Bp * Ip * cbytes                      # activations in
        + (w1p.size + w2p.size) * cbytes      # weights (single-buffered)
        + (b1p.size + b2p.size) * 4           # biases
        + Bp * Op * obytes                    # output
    )

    resident = pl.Buffered(1)  # grid-invariant operands: no double-buffering

    out = pl.pallas_call(
        bp_mlp_kernel,
        out_shape=jax.ShapeDtypeStruct((Bp, Op), out_dtype),
        grid_spec=pl.GridSpec(
            grid=(nb,),
            in_specs=[
                # Activations stream per batch tile (default 2-deep pipeline).
                pl.BlockSpec((TB, Ip), lambda i: (i, 0)),
                # Weights/biases stay VMEM-resident, single-buffered.
                pl.BlockSpec((Ip, Hp), lambda i: (0, 0), pipeline_mode=resident),
                pl.BlockSpec((1, Hp), lambda i: (0, 0), pipeline_mode=resident),
                pl.BlockSpec((Hp, Op), lambda i: (0, 0), pipeline_mode=resident),
                pl.BlockSpec((1, Op), lambda i: (0, 0), pipeline_mode=resident),
            ],
            out_specs=pl.BlockSpec((TB, Op), lambda i: (i, 0)),
        ),
        compiler_params=pltpu.CompilerParams(
            # Batch tiles are independent -> shard across TCs on v7x.
            dimension_semantics=("parallel",),
            vmem_limit_bytes=budget,
        ),
        cost_estimate=pl.CostEstimate(
            flops=flops, transcendentals=0, bytes_accessed=bytes_accessed),
    )(xp, w1p, b1p, w2p, b2p)

    if B == Bp and O == Op:
        return out
    return out[:B, :O]


# --------------------------------------------------------------------------- #
# Deterministic init mimicking nn.Linear's uniform(-1/sqrt(fan_in), ...)
# --------------------------------------------------------------------------- #
def init_params(key, input_size, hidden_size, output_size):
    k1, k2, k3, k4 = jax.random.split(key, 4)
    lim1 = 1.0 / jnp.sqrt(jnp.float32(input_size))
    lim2 = 1.0 / jnp.sqrt(jnp.float32(hidden_size))
    w1 = jax.random.uniform(k1, (input_size, hidden_size), jnp.float32, -lim1, lim1)
    b1 = jax.random.uniform(k2, (hidden_size,), jnp.float32, -lim1, lim1)
    w2 = jax.random.uniform(k3, (hidden_size, output_size), jnp.float32, -lim2, lim2)
    b2 = jax.random.uniform(k4, (output_size,), jnp.float32, -lim2, lim2)
    return w1, b1, w2, b2


if __name__ == "__main__":
    input_size, hidden_size, output_size = 32, 64, 16
    batch = 8

    key = jax.random.PRNGKey(0)
    kx, kp = jax.random.split(key)
    x = jax.random.normal(kx, (batch, input_size), jnp.float32)
    w1, b1, w2, b2 = init_params(kp, input_size, hidden_size, output_size)

    # One-time parameter prep (cast + pad), reused across forward calls.
    params = prepare_params(w1, b1, w2, b2)

    out = bp_network_forward(x, params)
    out = jax.block_until_ready(out)
    assert out.shape == (batch, output_size)
    assert out.dtype == x.dtype

    # Mixed-precision reference (bf16 operands, f32 accumulation) matching the
    # kernel's numerics.
    xr = x.astype(jnp.bfloat16).astype(jnp.float32)
    w1r = w1.astype(jnp.bfloat16).astype(jnp.float32)
    w2r = w2.astype(jnp.bfloat16).astype(jnp.float32)
    h = jnp.maximum(xr @ w1r + b1, 0.0)
    h = h.astype(jnp.bfloat16).astype(jnp.float32)
    ref_mp = h @ w2r + b2
    assert jnp.allclose(out.astype(jnp.float32), ref_mp, atol=1e-2, rtol=1e-2)

    # Sanity check against the pure-f32 reference (looser tolerance due to the
    # intentional bf16 cast of the matmul operands).
    ref_f32 = jnp.maximum(x @ w1 + b1, 0.0) @ w2 + b2
    assert jnp.allclose(out.astype(jnp.float32), ref_f32, atol=5e-2, rtol=5e-2)

    print("KERNEL_OK")
</pallas_src>

<mosaic_0001>
module attributes {stable_mosaic.version = 11 : i64} {
  func.func @bp_mlp_kernel(%arg0: i32, %arg1: memref<16x128xbf16, #tpu.memory_space<vmem>>, %arg2: memref<128x256xbf16, #tpu.memory_space<vmem>>, %arg3: memref<1x256xf32, #tpu.memory_space<vmem>>, %arg4: memref<256x256xbf16, #tpu.memory_space<vmem>>, %arg5: memref<1x256xf32, #tpu.memory_space<vmem>>, %arg6: memref<16x256xf32, #tpu.memory_space<vmem>>) attributes {dimension_semantics = [#tpu.dimension_semantics<parallel>], iteration_bounds = array<i64: 1>, scalar_prefetch = 0 : i64, scratch_operands = 0 : i64, tpu.core_type = #tpu.core_type<tc>, window_params = [{transform_indices = @transform_0, window_bounds = array<i64: 16, 128>}, {pipeline_mode = #tpu.pipeline_mode<synchronous>, transform_indices = @transform_1, window_bounds = array<i64: 128, 256>}, {pipeline_mode = #tpu.pipeline_mode<synchronous>, transform_indices = @transform_2, window_bounds = array<i64: 1, 256>}, {pipeline_mode = #tpu.pipeline_mode<synchronous>, transform_indices = @transform_3, window_bounds = array<i64: 256, 256>}, {pipeline_mode = #tpu.pipeline_mode<synchronous>, transform_indices = @transform_4, window_bounds = array<i64: 1, 256>}, {transform_indices = @transform_5, window_bounds = array<i64: 16, 256>}]} {
    %c0 = arith.constant 0 : index
    %c0_0 = arith.constant 0 : index
    %0 = vector.load %arg1[%c0, %c0_0] : memref<16x128xbf16, #tpu.memory_space<vmem>>, vector<16x128xbf16>
    %c0_1 = arith.constant 0 : index
    %c0_2 = arith.constant 0 : index
    %1 = vector.load %arg2[%c0_1, %c0_2] : memref<128x256xbf16, #tpu.memory_space<vmem>>, vector<128x256xbf16>
    %cst = arith.constant dense<0.000000e+00> : vector<16x256xf32>
    %2 = tpu.matmul %0, %1, %cst {dimension_numbers = #tpu.dot_dimension_numbers<[1], [0], [0], [1], [0, 0, 1, 1], [], []>} : vector<16x128xbf16>, vector<128x256xbf16>, vector<16x256xf32> -> vector<16x256xf32>
    %c0_3 = arith.constant 0 : index
    %c0_4 = arith.constant 0 : index
    %3 = vector.load %arg3[%c0_3, %c0_4] : memref<1x256xf32, #tpu.memory_space<vmem>>, vector<1x256xf32>
    %4 = vector.broadcast %3 : vector<1x256xf32> to vector<16x256xf32>
    %5 = arith.addf %2, %4 : vector<16x256xf32>
    %cst_5 = arith.constant 0.000000e+00 : f32
    %6 = vector.broadcast %cst_5 : f32 to vector<16x256xf32>
    %7 = arith.maximumf %5, %6 : vector<16x256xf32>
    %8 = arith.truncf %7 : vector<16x256xf32> to vector<16x256xbf16>
    %c0_6 = arith.constant 0 : index
    %c0_7 = arith.constant 0 : index
    %9 = vector.load %arg4[%c0_6, %c0_7] : memref<256x256xbf16, #tpu.memory_space<vmem>>, vector<256x256xbf16>
    %cst_8 = arith.constant dense<0.000000e+00> : vector<16x256xf32>
    %10 = tpu.matmul %8, %9, %cst_8 {dimension_numbers = #tpu.dot_dimension_numbers<[1], [0], [0], [1], [0, 0, 1, 1], [], []>} : vector<16x256xbf16>, vector<256x256xbf16>, vector<16x256xf32> -> vector<16x256xf32>
    %c0_9 = arith.constant 0 : index
    %c0_10 = arith.constant 0 : index
    %11 = vector.load %arg5[%c0_9, %c0_10] : memref<1x256xf32, #tpu.memory_space<vmem>>, vector<1x256xf32>
    %12 = vector.broadcast %11 : vector<1x256xf32> to vector<16x256xf32>
    %13 = arith.addf %10, %12 : vector<16x256xf32>
    %c0_11 = arith.constant 0 : index
    %c0_12 = arith.constant 0 : index
    %14 = vector.load %arg6[%c0_11, %c0_12] : memref<16x256xf32, #tpu.memory_space<vmem>>, vector<16x256xf32>
    tpu.vector_store %arg6[%c0_11, %c0_12], %13 {strides = array<i32>} : memref<16x256xf32, #tpu.memory_space<vmem>>, vector<16x256xf32>,
    return
  }
  func.func @transform_0(%arg0: i32) -> (i32, i32) {
    %c0_i32 = arith.constant 0 : i32
    %c0_i32_0 = arith.constant 0 : i32
    return %arg0, %c0_i32 : i32, i32
  }
  func.func @transform_1(%arg0: i32) -> (i32, i32) {
    %c0_i32 = arith.constant 0 : i32
    %c0_i32_0 = arith.constant 0 : i32
    %c0_i32_1 = arith.constant 0 : i32
    return %c0_i32, %c0_i32_0 : i32, i32
  }
  func.func @transform_2(%arg0: i32) -> (i32, i32) {
    %c0_i32 = arith.constant 0 : i32
    %c0_i32_0 = arith.constant 0 : i32
    %c0_i32_1 = arith.constant 0 : i32
    return %c0_i32, %c0_i32_0 : i32, i32
  }
  func.func @transform_3(%arg0: i32) -> (i32, i32) {
    %c0_i32 = arith.constant 0 : i32
    %c0_i32_0 = arith.constant 0 : i32
    %c0_i32_1 = arith.constant 0 : i32
    return %c0_i32, %c0_i32_0 : i32, i32
  }
  func.func @transform_4(%arg0: i32) -> (i32, i32) {
    %c0_i32 = arith.constant 0 : i32
    %c0_i32_0 = arith.constant 0 : i32
    %c0_i32_1 = arith.constant 0 : i32
    return %c0_i32, %c0_i32_0 : i32, i32
  }
  func.func @transform_5(%arg0: i32) -> (i32, i32) {
    %c0_i32 = arith.constant 0 : i32
    %c0_i32_0 = arith.constant 0 : i32
    return %arg0, %c0_i32 : i32, i32
  }
}

</mosaic_0001>

<bundles_post_ra>
// kernel: tpu_custom_call.1
= control target key start
LH: loop header
LB: loop body
LE: loop exit
PB: predicated region body
PF: predicated region fallthrough
CT: control target
= control target key end

     0   :  { %10 = vsyncpa [#allocation3], 0  ;;  %s775_s0 = inlined_call_operand.hbm [shape: bf16[16,128], index: 0, kind: input, shape index: {}]   ;;  %s776_s1 = inlined_call_operand.hbm [shape: bf16[128,256], index: 1, kind: input, shape index: {}]   ;;  %s777_s2 = inlined_call_operand.vmem [shape: f32[1,256], index: 2, kind: input, shape index: {}]   ;;  %s778_s3 = inlined_call_operand.hbm [shape: bf16[256,256], index: 3, kind: input, shape index: {}]   ;;  %s779_s4 = inlined_call_operand.vmem [shape: f32[1,256], index: 4, kind: input, shape index: {}]   ;;  %s780_s5 = inlined_call_operand.hbm [shape: f32[16,256], index: 5, kind: output, shape index: {}]  }
   0x1   :  { %11 = vsyncpa [#allocation6], 0 }
   0x2   :  { %12 = vsyncpa [#allocation4], 0  ;;  %s716_s18 = smov [#allocation5]  }
   0x3   :  { %s30_s19 = sshll.u32 %s716_s18, 4  ;;  %s31_s19 = int_to_ptr.vmem [resolvable:$true] %s30_s19 }
   0x4   :  { %s638_s20 = scalar_lea.vmem %s31_s19, 2048  ;;  %p643_p1 = scmp.lt.s32.totalorder %s31_s19, %s31_s19 }
   0x5   :  { %p639_p0 = scmp.ne.s32.totalorder %s31_s19, %s638_s20  ;;  %p644_p2 = scmp.lt.s32.totalorder %s638_s20, %s638_s20 }
   0x7   :  { %p645_p3 = por %p644_p2, %p643_p1 }
   0x9   :  { %p646_p4 = pnand %p645_p3, %p639_p0 }
   0xb   :  { %649 = shalt.err (!%p646_p4)
}
   0xc   :  { %s717_s21 = smov 128   ;;  %s718_s22 = smov 8  }
   0xd   :  { %36 = dma.hbm_to_vmem [thread:$0]  %s776_s1, 2048, %s31_s19, [#allocation6], %s717_s21, %s717_s21, %s718_s22  }
   0xe   :  { %s719_s25 = smov [#allocation2]  }
   0xf   :  { %s18_s26 = sshll.u32 %s719_s25, 4  ;;  %s19_s26 = int_to_ptr.vmem [resolvable:$true] %s18_s26 }
  0x10   :  { %s658_s27 = scalar_lea.vmem %s19_s26, 128  ;;  %p663_p6 = scmp.lt.s32.totalorder %s19_s26, %s19_s26 }
  0x11   :  { %p659_p5 = scmp.ne.s32.totalorder %s19_s26, %s658_s27  ;;  %p664_p7 = scmp.lt.s32.totalorder %s658_s27, %s658_s27 }
  0x13   :  { %p665_p8 = por %p664_p7, %p663_p6 }
  0x15   :  { %p666_p9 = pnand %p665_p8, %p659_p5 }
  0x17   :  { %669 = shalt.err (!%p666_p9)
}
  0x18   :  { %s720_s28 = smov 64   ;;  %s721_s29 = smov 4  }
  0x19   :  { %24 = dma.hbm_to_vmem [thread:$0]  %s775_s0, 128, %s19_s26, [#allocation3], %s720_s28, %s720_s28, %s721_s29  }
  0x1a   :  { %s722_s7 = smov [#allocation7]  }
  0x1b   :  { %s44_s8 = sshll.u32 %s722_s7, 4  ;;  %s45_s8 = int_to_ptr.vmem [resolvable:$true] %s44_s8 }
  0x1c   :  { %s678_s1 = scalar_lea.vmem %s45_s8, 4096  ;;  %p683_p11 = scmp.lt.s32.totalorder %s45_s8, %s45_s8 }
  0x1d   :  { %p679_p10 = scmp.ne.s32.totalorder %s45_s8, %s678_s1  ;;  %p684_p12 = scmp.lt.s32.totalorder %s678_s1, %s678_s1 }
  0x1f   :  { %p685_p13 = por %p684_p12, %p683_p11 }
  0x21   :  { %p686_p0 = pnand %p685_p13, %p679_p10 }
  0x23   :  { %689 = shalt.err (!%p686_p0)
}
  0x24   :  { %50 = dma.hbm_to_vmem [thread:$0]  %s778_s3, 4096, %s45_s8, [#allocation6], %s717_s21, %s717_s21, %s718_s22  }
  0x25   :  { %710 = dma.done.wait [#allocation3], 128  }
  0x26   :  { %711 = vsyncadd [#allocation3], 4294967168 }
  0x27   :  { %712 = dma.done.wait [#allocation6], 6144  }
  0x28   :  { %713 = vsyncadd [#allocation6], 4294961152  ;;  %v723_v0 = vmov 0   ;;  %v557_v1 = vld [vmem:[#allocation5 + $0x74] ss:$8 sps:$4 sm:$0xff]   ;;  %v83_v50 = vlaneseq  ;;  %s724_s12 = smov [#allocation8]  }
  0x29   :  { %211 = vmatprep.mubr.bf16.mxu0 %v723_v0  ;;  %v559_v2 = vld [vmem:[#allocation5 + $0x70] ss:$8 sps:$4 sm:$0xff]   ;;  %179 = vmatprep.subr.bf16.mxu0 %v557_v1  ;;  %v560_v3 = vld [vmem:[#allocation5 + $0x64] ss:$8 sps:$4 sm:$0xff]   ;;  %v562_v4 = vld [vmem:[#allocation5 + $0x60] ss:$8 sps:$4 sm:$0xff]  }
  0x2a   :  { %180 = vmatpush1.bf16.msra.mxu0 %v559_v2  ;;  %v563_v5 = vld [vmem:[#allocation5 + $0x54] ss:$8 sps:$4 sm:$0xff]   ;;  %v565_v6 = vld [vmem:[#allocation5 + $0x50] ss:$8 sps:$4 sm:$0xff]   ;;  %v566_v7 = vld [vmem:[#allocation5 + $0x44] ss:$8 sps:$4 sm:$0xff]  }
  0x2b   :  { %181 = vmatprep.subr.bf16.mxu0 %v560_v3  ;;  %v568_v8 = vld [vmem:[#allocation5 + $0x40] ss:$8 sps:$4 sm:$0xff]   ;;  %v569_v9 = vld [vmem:[#allocation5 + $0x34] ss:$8 sps:$4 sm:$0xff]   ;;  %v584_v11 = vld [vmem:[#allocation7 + $0x70] ss:$8 sps:$4 sm:$0xff]  }
  0x2c   :  { %v582_v10 = vld [vmem:[#allocation7 + $0x74] ss:$8 sps:$4 sm:$0xff]   ;;  %v585_v12 = vld [vmem:[#allocation7 + $0x64] ss:$8 sps:$4 sm:$0xff]   ;;  %v571_v13 = vld [vmem:[#allocation5 + $0x30] ss:$8 sps:$4 sm:$0xff]  }
  0x2d   :  { %432 = vmatprep.subr.bf16.mxu1 %v582_v10  ;;  %v587_v14 = vld [vmem:[#allocation7 + $0x60] ss:$8 sps:$4 sm:$0xff]   ;;  %v572_v15 = vld [vmem:[#allocation5 + $0x24] ss:$8 sps:$4 sm:$0xff]   ;;  %v588_v16 = vld [vmem:[#allocation7 + $0x54] ss:$8 sps:$4 sm:$0xff]  }
  0x2e   :  { %182 = vmatpush1.bf16.msra.mxu0 %v562_v4  ;;  %433 = vmatpush1.bf16.msra.mxu1 %v584_v11  ;;  %v574_v17 = vld [vmem:[#allocation5 + $0x20] ss:$8 sps:$4 sm:$0xff]   ;;  %v590_v18 = vld [vmem:[#allocation7 + $0x50] ss:$8 sps:$4 sm:$0xff]   ;;  %v575_v19 = vld [vmem:[#allocation5 + $0x14] ss:$8 sps:$4 sm:$0xff]  }
  0x2f   :  { %183 = vmatprep.subr.bf16.mxu0 %v563_v5  ;;  %434 = vmatprep.subr.bf16.mxu1 %v585_v12  ;;  %v591_v20 = vld [vmem:[#allocation7 + $0x44] ss:$8 sps:$4 sm:$0xff]   ;;  %v577_v21 = vld [vmem:[#allocation5 + $0x10] ss:$8 sps:$4 sm:$0xff]   ;;  %v593_v22 = vld [vmem:[#allocation7 + $0x40] ss:$8 sps:$4 sm:$0xff]  }
  0x30   :  { %v578_v23 = vld [vmem:[#allocation5 + $0x4] ss:$8 sps:$4 sm:$0xff]   ;;  %v594_v24 = vld [vmem:[#allocation7 + $0x34] ss:$8 sps:$4 sm:$0xff]   ;;  %v580_v25 = vld [vmem:[#allocation5] ss:$8 sps:$4 sm:$0xff]  }
  0x31   :  { %v596_v26 = vld [vmem:[#allocation7 + $0x30] ss:$8 sps:$4 sm:$0xff]   ;;  %v597_v27 = vld [vmem:[#allocation7 + $0x24] ss:$8 sps:$4 sm:$0xff]   ;;  %v599_v29 = vld [vmem:[#allocation7 + $0x20] ss:$8 sps:$4 sm:$0xff]  }
  0x32   :  { %184 = vmatpush1.bf16.msra.mxu0 %v565_v6  ;;  %435 = vmatpush1.bf16.msra.mxu1 %v587_v14  ;;  %v581_v28 = vld [vmem:[#allocation2] sm:$0xff]   ;;  %v603_v32 = vld [vmem:[#allocation7 + $0x4] ss:$8 sps:$4 sm:$0xff]   ;;  %v605_v33 = vld [vmem:[#allocation7] ss:$8 sps:$4 sm:$0xff]   ;;  %v84_v51 = vshrl.u32 %v83_v50, 7 }
  0x33   :  { %185 = vmatprep.subr.bf16.mxu0 %v566_v7  ;;  %436 = vmatprep.subr.bf16.mxu1 %v588_v16  ;;  %v600_v30 = vld [vmem:[#allocation7 + $0x14] ss:$8 sps:$4 sm:$0xff]   ;;  %v602_v31 = vld [vmem:[#allocation7 + $0x10] ss:$8 sps:$4 sm:$0xff]   ;;  %v609_v36 = vld [vmem:[#allocation7 + $0xe4] ss:$8 sps:$4 sm:$0xff]  }
  0x34   :  { %v606_v34 = vld [vmem:[#allocation7 + $0xf4] ss:$8 sps:$4 sm:$0xff]   ;;  %v608_v35 = vld [vmem:[#allocation7 + $0xf0] ss:$8 sps:$4 sm:$0xff]   ;;  %v611_v37 = vld [vmem:[#allocation7 + $0xe0] ss:$8 sps:$4 sm:$0xff]  }
  0x35   :  { %v612_v38 = vld [vmem:[#allocation7 + $0xd4] ss:$8 sps:$4 sm:$0xff]   ;;  %v614_v39 = vld [vmem:[#allocation7 + $0xd0] ss:$8 sps:$4 sm:$0xff]   ;;  %v615_v40 = vld [vmem:[#allocation7 + $0xc4] ss:$8 sps:$4 sm:$0xff]  }
  0x36   :  { %186 = vmatpush1.bf16.msra.mxu0 %v568_v8  ;;  %437 = vmatpush1.bf16.msra.mxu1 %v590_v18  ;;  %v617_v41 = vld [vmem:[#allocation7 + $0xc0] ss:$8 sps:$4 sm:$0xff]   ;;  %v618_v42 = vld [vmem:[#allocation7 + $0xb4] ss:$8 sps:$4 sm:$0xff]   ;;  %v620_v43 = vld [vmem:[#allocation7 + $0xb0] ss:$8 sps:$4 sm:$0xff]  }
  0x37   :  { %187 = vmatprep.subr.bf16.mxu0 %v569_v9  ;;  %438 = vmatprep.subr.bf16.mxu1 %v591_v20  ;;  %v621_v44 = vld [vmem:[#allocation7 + $0xa4] ss:$8 sps:$4 sm:$0xff]   ;;  %v623_v45 = vld [vmem:[#allocation7 + $0xa0] ss:$8 sps:$4 sm:$0xff]   ;;  %v624_v46 = vld [vmem:[#allocation7 + $0x94] ss:$8 sps:$4 sm:$0xff]  }
  0x38   :  { %v626_v47 = vld [vmem:[#allocation7 + $0x90] ss:$8 sps:$4 sm:$0xff]   ;;  %v627_v48 = vld [vmem:[#allocation7 + $0x84] ss:$8 sps:$4 sm:$0xff]   ;;  %v629_v49 = vld [vmem:[#allocation7 + $0x80] ss:$8 sps:$4 sm:$0xff]  }
  0x39   :  { %v89_v52 = vsub.s32 1, %v84_v51  ;;  %v85_v53 = vsub.s32 0, %v84_v51  ;;  %v81_v54 = vld [vmem:[%s777_s2] sm:$0x3]  ;;  %s484_s13 = sshll.u32 %s724_s12, 4  ;;  %s485_s13 = int_to_ptr.vmem [resolvable:$true] %s484_s13 }
  0x3a   :  { %188 = vmatpush1.bf16.msra.mxu0 %v571_v13  ;;  %439 = vmatpush1.bf16.msra.mxu1 %v593_v22  ;;  %v260_v7 = vld [vmem:[%s779_s4] sm:$0x3]  ;;  %s690_s14 = scalar_lea.vmem %s485_s13, 512  ;;  %p695_p2 = scmp.lt.s32.totalorder %s485_s13, %s485_s13 }
  0x3b   :  { %189 = vmatprep.subr.bf16.mxu0 %v572_v15  ;;  %440 = vmatprep.subr.bf16.mxu1 %v594_v24  ;;  %v90_v56 = vrot.slane %v81_v54, %v89_v52  ;;  %v86_v57 = vrot.slane %v81_v54, %v85_v53  ;;  %v265_v8 = vrot.slane %v260_v7, %v85_v53  ;;  %p691_p1 = scmp.ne.s32.totalorder %s485_s13, %s690_s14  ;;  %p696_p3 = scmp.lt.s32.totalorder %s690_s14, %s690_s14 }
  0x3c   :  { %v269_v9 = vrot.slane %v260_v7, %v89_v52 }
  0x3d   :  { %p697_p4 = por %p696_p3, %p695_p2 }
  0x3e   :  { %190 = vmatpush1.bf16.msra.mxu0 %v574_v17  ;;  %441 = vmatpush1.bf16.msra.mxu1 %v596_v26 }
  0x3f   :  { %191 = vmatprep.subr.bf16.mxu0 %v575_v19  ;;  %442 = vmatprep.subr.bf16.mxu1 %v597_v27  ;;  %p698_p5 = pnand %p697_p4, %p691_p1 }
  0x42   :  { %192 = vmatpush1.bf16.msra.mxu0 %v577_v21  ;;  %443 = vmatpush1.bf16.msra.mxu1 %v599_v29 }
  0x43   :  { %193 = vmatprep.subr.bf16.mxu0 %v578_v23  ;;  %444 = vmatprep.subr.bf16.mxu1 %v600_v30 }
  0x46   :  { %194 = vmatpush1.bf16.msra.mxu0 %v580_v25  ;;  %445 = vmatpush1.bf16.msra.mxu1 %v602_v31 }
  0x47   :  { %446 = vmatprep.subr.bf16.mxu1 %v603_v32 }
  0x49   :  { %212 = vmatmul.mubr.bf16.vlgmr.msra.gmra.mxu0 %v581_v28 }
  0x4a   :  { %447 = vmatpush1.bf16.msra.mxu1 %v605_v33 }
  0x4b   :  { %448 = vmatprep.subr.bf16.mxu1 %v606_v34 }
  0x4e   :  { %449 = vmatpush2.bf16.msra.mxu1 %v608_v35 }
  0x4f   :  { %450 = vmatprep.subr.bf16.mxu1 %v609_v36 }
  0x52   :  { %451 = vmatpush2.bf16.msra.mxu1 %v611_v37 }
  0x53   :  { %452 = vmatprep.subr.bf16.mxu1 %v612_v38 }
  0x56   :  { %453 = vmatpush2.bf16.msra.mxu1 %v614_v39 }
  0x57   :  { %454 = vmatprep.subr.bf16.mxu1 %v615_v40 }
  0x5a   :  { %455 = vmatpush2.bf16.msra.mxu1 %v617_v41 }
  0x5b   :  { %456 = vmatprep.subr.bf16.mxu1 %v618_v42 }
  0x5e   :  { %457 = vmatpush2.bf16.msra.mxu1 %v620_v43 }
  0x5f   :  { %458 = vmatprep.subr.bf16.mxu1 %v621_v44 }
  0x62   :  { %459 = vmatpush2.bf16.msra.mxu1 %v623_v45 }
  0x63   :  { %460 = vmatprep.subr.bf16.mxu1 %v624_v46 }
  0x66   :  { %461 = vmatpush2.bf16.msra.mxu1 %v626_v47 }
  0x67   :  { %462 = vmatprep.subr.bf16.mxu1 %v627_v48 }
  0x6a   :  { %463 = vmatpush2.bf16.msra.mxu1 %v629_v49 }
 0x109   :  { %v213_v55 = vpop.f32.mrf.mxu0 }
 0x10a   :  { %v214_v62 = vadd.f32 %v213_v55, %v86_v57 }
 0x10b   :  { %v215_v58 = vpop.f32.mrf.mxu0 }
 0x10c   :  { %v216_v60 = vadd.f32 %v215_v58, %v90_v56  ;;  %v222_v4 = vmax.f32 %v214_v62, 0.0 }
 0x10d   :  { %v217_v59 = vpop.f32.mrf.mxu0 }
 0x10e   :  { %v218_v61 = vadd.f32 %v217_v59, %v86_v57  ;;  %v223_v2 = vmax.f32 %v216_v60, 0.0 }
 0x10f   :  { %v219_v63 = vpop.f32.mrf.mxu0 }
 0x110   :  { %v220_v0 = vadd.f32 %v219_v63, %v90_v56  ;;  %v224_v1 = vmax.f32 %v218_v61, 0.0 }
 0x112   :  { %v225_v3 = vmax.f32 %v220_v0, 0.0  ;;  %v226_v6 = vpack.c.bf16 %v224_v1, %v222_v4 }
 0x114   :  { %v227_v5 = vpack.c.bf16 %v225_v3, %v223_v2 }
 0x116   :  { %464 = vmatprep.mubr.bf16.mxu1 %v227_v5 }
 0x117   :  { %465 = vmatmul.mubr.bf16.vlgmr.msra.gmra.mxu1 %v226_v6 }
 0x1d7   :  { %v466_v10 = vpop.f32.mrf.mxu1 }
 0x1d8   :  { %v467_v11 = vadd.f32 %v466_v10, %v265_v8 }
 0x1d9   :  { %v468_v12 = vpop.f32.mrf.mxu1 }
 0x1da   :  { %475 = vst [vmem:[#allocation8] sm:$0xff] %v467_v11  ;;  %v469_v13 = vadd.f32 %v468_v12, %v269_v9 }
 0x1db   :  { %v470_v14 = vpop.f32.mrf.mxu1 }
 0x1dc   :  { %476 = vst [vmem:[#allocation8 + $0x8] sm:$0xff] %v469_v13  ;;  %v471_v15 = vadd.f32 %v470_v14, %v265_v8 }
 0x1dd   :  { %v472_v16 = vpop.f32.mrf.mxu1 }
 0x1de   :  { %477 = vst [vmem:[#allocation8 + $0x10] sm:$0xff] %v471_v15  ;;  %v473_v17 = vadd.f32 %v472_v16, %v269_v9 }
 0x1e0   :  { %478 = vst [vmem:[#allocation8 + $0x18] sm:$0xff] %v473_v17 }
 0x1e1   :  { %701 = shalt.err (!%p698_p5)
}
 0x1e2   :  { %s725_s4 = smov 256   ;;  %s726_s15 = smov 16  }
 0x1e3   :  { %490 = dma.vmem_to_hbm [thread:$0]  %s485_s13, 512, %s780_s5, [#allocation4], %s725_s4, %s725_s4, %s726_s15  }
 0x1e4   :  { %714 = dma.done.wait [#allocation4], 512  }
 0x1e5   :  { %715 = vsyncadd [#allocation4], 4294966784 }
 0x1e6   :  { %494 = vsyncpa [#allocation3], 1 }
 0x1e7   :  { %495 = vsyncpa [#allocation6], 1 }
 0x1e8   :  { %496 = vsyncpa [#allocation4], 1 }

</bundles_post_ra>
